<compile_context>
chip_gen: v6e
topology: v6e:2x2x1
jax: 0.10.0
libtpu: 0.0.40
codegen_flags: <defaults>
</compile_context>

<pallas_src>
import jax
import jax.numpy as jnp
from jax.experimental import pallas as pl
from jax.experimental.pallas import tpu as pltpu

TAU = 2.0    # spikingjelly LIFNode defaults: tau=2.0, v_threshold=1.0,
V_TH = 1.0   # v_reset=0.0, decay_input=True, v0=0  ->  v = x/tau + b/tau


def _snn_kernel(patches_ref, wconv_ref, thr_ref, pool_ref, wfc_ref, bfc_ref,
                out_ref, pooled_acc):
    # patches_ref: (TM, Kpad)   wconv_ref: (Kpad, Cout)   thr_ref: (1, Cout)
    # pool_ref:    (B, TM)      wfc_ref:   (Cout, ncls)   bfc_ref: (1, ncls)
    # out_ref:     (B, ncls)    pooled_acc (scratch):     (B, Cout) f32
    step = pl.program_id(0)

    @pl.when(step == 0)
    def _():
        pooled_acc[...] = jnp.zeros_like(pooled_acc)

    # Conv as one lane-dense matmul over the zero-padded K=128 contraction.
    conv = jnp.dot(patches_ref[...], wconv_ref[...],
                   preferred_element_type=jnp.float32)              # (TM, Cout)

    # LIF node (single step): v = (conv + b)/tau, spike = (v >= v_th),
    # fused with the conv bias into one per-channel threshold compare.
    spikes = (conv >= thr_ref[...]).astype(jnp.float32)             # (TM, Cout)

    # AdaptiveAvgPool2d((1,1)) == per-batch mean over HW, computed as an MXU
    # matmul with a block-ones/HW pooling matrix (padded rows have zero weight).
    pooled_acc[...] += jnp.dot(pool_ref[...], spikes,
                               preferred_element_type=jnp.float32)  # (B, Cout)

    @pl.when(step == pl.num_programs(0) - 1)
    def _():
        out_ref[...] = (jnp.dot(pooled_acc[...], wfc_ref[...],
                                preferred_element_type=jnp.float32)
                        + bfc_ref[...])                             # (B, ncls)


@jax.jit
def simple_snn_forward(x_nchw, conv_w, conv_b, fc_w, fc_b):
    """x_nchw: (B, Cin, H, W) f32. conv_w: (Cout, Cin, 3, 3), conv_b: (Cout,),
    fc_w: (nclass, Cout), fc_b: (nclass,)  (PyTorch layouts). Returns (B, nclass)."""
    B, Cin, H, W = x_nchw.shape
    Cout = conv_w.shape[0]
    nclass = fc_w.shape[0]
    K = 3
    HW = H * W
    Kdim = K * K * Cin
    Kpad = 128 * pl.cdiv(Kdim, 128)            # 108 -> 128 (lane-dense K)

    # ---- glue: layout + im2col (data rearrangement only, no arithmetic) ------
    # TODO(synk): for large H/W/B build the patch tile inside the kernel from a
    # DMA'd NHWC block instead of materializing the 9x-duplicated patches in HBM.
    x = jnp.transpose(x_nchw, (0, 2, 3, 1))                         # NHWC
    xp = jnp.pad(x, ((0, 0), (1, 1), (1, 1), (0, 0)))               # padding=1
    cols = [xp[:, kh:kh + H, kw:kw + W, :] for kh in range(K) for kw in range(K)]
    patches = jnp.concatenate(cols, axis=-1).reshape(B * HW, Kdim)
    patches = jnp.pad(patches, ((0, 0), (0, Kpad - Kdim)))          # (R, Kpad)

    # Fold the whole batch into the row dim; one large tile (few steps if huge).
    R = B * HW
    TM = R if R <= 1024 else 1024
    Rp = TM * pl.cdiv(R, TM)
    if Rp != R:
        patches = jnp.pad(patches, ((0, Rp - R), (0, 0)))
    n_steps = Rp // TM

    # Weights in matmul-friendly layouts; contraction rows zero-padded to match.
    wconv = jnp.transpose(conv_w, (2, 3, 1, 0)).reshape(Kdim, Cout)
    wconv = jnp.pad(wconv, ((0, Kpad - Kdim), (0, 0)))              # (Kpad, Cout)
    thr = (TAU * V_TH - conv_b).reshape(1, Cout)                    # fused bias+LIF
    wfc = jnp.transpose(fc_w, (1, 0))                               # (Cout, nclass)
    bfc = fc_b.reshape(1, nclass)

    # Block-diagonal pooling matrix: pool[b, r] = 1/HW iff row r belongs to batch
    # b; zero for padded rows, so padding never affects the result.
    row_batch = jnp.arange(Rp) // HW
    pool = (row_batch[None, :] == jnp.arange(B)[:, None]).astype(jnp.float32) / HW

    return pl.pallas_call(
        _snn_kernel,
        out_shape=jax.ShapeDtypeStruct((B, nclass), jnp.float32),
        grid_spec=pltpu.PrefetchScalarGridSpec(
            num_scalar_prefetch=0,
            grid=(n_steps,),
            in_specs=[
                pl.BlockSpec((TM, Kpad), lambda i: (i, 0)),      # patches
                pl.BlockSpec((Kpad, Cout), lambda i: (0, 0)),    # conv weight
                pl.BlockSpec((1, Cout), lambda i: (0, 0)),       # fused threshold
                pl.BlockSpec((B, TM), lambda i: (0, i)),         # pooling matrix
                pl.BlockSpec((Cout, nclass), lambda i: (0, 0)),  # fc weight
                pl.BlockSpec((1, nclass), lambda i: (0, 0)),     # fc bias
            ],
            out_specs=pl.BlockSpec((B, nclass), lambda i: (0, 0)),
            scratch_shapes=[pltpu.VMEM((B, Cout), jnp.float32)],
        ),
        compiler_params=pltpu.CompilerParams(
            dimension_semantics=("arbitrary",)),
    )(patches, wconv, thr, pool, wfc, bfc)


if __name__ == "__main__":
    key = jax.random.PRNGKey(0)
    kx, kw1, kb1, kw2, kb2 = jax.random.split(key, 5)

    # small shapes consistent with the module: (B, C=12, W, T)
    B, Cin, H, W = 2, 12, 16, 16
    Cout, nclass = 32, 2

    x = jax.random.normal(kx, (B, Cin, H, W), jnp.float32)
    conv_w = 0.3 * jax.random.normal(kw1, (Cout, Cin, 3, 3), jnp.float32)
    conv_b = 0.1 * jax.random.normal(kb1, (Cout,), jnp.float32)
    fc_w = 0.1 * jax.random.normal(kw2, (nclass, Cout), jnp.float32)
    fc_b = 0.1 * jax.random.normal(kb2, (nclass,), jnp.float32)

    out = simple_snn_forward(x, conv_w, conv_b, fc_w, fc_b)
    out = jax.block_until_ready(out)

    assert out.shape == (B, nclass), out.shape
    assert bool(jnp.all(jnp.isfinite(out)))
    print("KERNEL_OK")
</pallas_src>

<mosaic_0001>
module attributes {stable_mosaic.version = 11 : i64} {
  func.func @_snn_kernel(%arg0: i32, %arg1: memref<512x128xf32, #tpu.memory_space<vmem>>, %arg2: memref<128x32xf32, #tpu.memory_space<vmem>>, %arg3: memref<1x32xf32, #tpu.memory_space<vmem>>, %arg4: memref<2x512xf32, #tpu.memory_space<vmem>>, %arg5: memref<32x2xf32, #tpu.memory_space<vmem>>, %arg6: memref<1x2xf32, #tpu.memory_space<vmem>>, %arg7: memref<2x2xf32, #tpu.memory_space<vmem>>, %arg8: memref<2x32xf32, #tpu.memory_space<vmem>>) attributes {dimension_semantics = [#tpu.dimension_semantics<arbitrary>], iteration_bounds = array<i64: 1>, scalar_prefetch = 0 : i64, scratch_operands = 1 : i64, tpu.core_type = #tpu.core_type<tc>, window_params = [{transform_indices = @transform_0, window_bounds = array<i64: 512, 128>}, {pipeline_mode = #tpu.pipeline_mode<synchronous>, transform_indices = @transform_1, window_bounds = array<i64: 128, 32>}, {pipeline_mode = #tpu.pipeline_mode<synchronous>, transform_indices = @transform_2, window_bounds = array<i64: 1, 32>}, {transform_indices = @transform_3, window_bounds = array<i64: 2, 512>}, {pipeline_mode = #tpu.pipeline_mode<synchronous>, transform_indices = @transform_4, window_bounds = array<i64: 32, 2>}, {pipeline_mode = #tpu.pipeline_mode<synchronous>, transform_indices = @transform_5, window_bounds = array<i64: 1, 2>}, {pipeline_mode = #tpu.pipeline_mode<synchronous>, transform_indices = @transform_6, window_bounds = array<i64: 2, 2>}]} {
    %c0_i32 = arith.constant 0 : i32
    %0 = arith.cmpi eq, %arg0, %c0_i32 : i32
    %1 = arith.extui %0 : i1 to i32
    %c0_i32_0 = arith.constant 0 : i32
    %2 = arith.cmpi ne, %1, %c0_i32_0 : i32
    scf.if %2 {
      %cst_15 = arith.constant 0.000000e+00 : f32
      %19 = vector.broadcast %cst_15 : f32 to vector<2x32xf32>
      %c0_16 = arith.constant 0 : index
      %c0_17 = arith.constant 0 : index
      %20 = vector.load %arg8[%c0_16, %c0_17] : memref<2x32xf32, #tpu.memory_space<vmem>>, vector<2x32xf32>
      tpu.vector_store %arg8[%c0_16, %c0_17], %19 {strides = array<i32>} : memref<2x32xf32, #tpu.memory_space<vmem>>, vector<2x32xf32>,
    } else {
    }
    %c0 = arith.constant 0 : index
    %c0_1 = arith.constant 0 : index
    %3 = vector.load %arg1[%c0, %c0_1] : memref<512x128xf32, #tpu.memory_space<vmem>>, vector<512x128xf32>
    %c0_2 = arith.constant 0 : index
    %c0_3 = arith.constant 0 : index
    %4 = vector.load %arg2[%c0_2, %c0_3] : memref<128x32xf32, #tpu.memory_space<vmem>>, vector<128x32xf32>
    %cst = arith.constant dense<0.000000e+00> : vector<512x32xf32>
    %5 = tpu.matmul %3, %4, %cst {dimension_numbers = #tpu.dot_dimension_numbers<[1], [0], [0], [1], [0, 0, 1, 1], [], []>} : vector<512x128xf32>, vector<128x32xf32>, vector<512x32xf32> -> vector<512x32xf32>
    %c0_4 = arith.constant 0 : index
    %c0_5 = arith.constant 0 : index
    %6 = vector.load %arg3[%c0_4, %c0_5] : memref<1x32xf32, #tpu.memory_space<vmem>>, vector<1x32xf32>
    %7 = vector.broadcast %6 : vector<1x32xf32> to vector<512x32xf32>
    %8 = arith.cmpf oge, %5, %7 : vector<512x32xf32>
    %9 = arith.extui %8 : vector<512x32xi1> to vector<512x32xi32>
    %10 = arith.sitofp %9 : vector<512x32xi32> to vector<512x32xf32>
    %c0_6 = arith.constant 0 : index
    %c0_7 = arith.constant 0 : index
    %11 = vector.load %arg8[%c0_6, %c0_7] : memref<2x32xf32, #tpu.memory_space<vmem>>, vector<2x32xf32>
    %c0_8 = arith.constant 0 : index
    %c0_9 = arith.constant 0 : index
    %12 = vector.load %arg4[%c0_8, %c0_9] : memref<2x512xf32, #tpu.memory_space<vmem>>, vector<2x512xf32>
    %cst_10 = arith.constant dense<0.000000e+00> : vector<2x32xf32>
    %13 = tpu.matmul %12, %10, %cst_10 {dimension_numbers = #tpu.dot_dimension_numbers<[1], [0], [0], [1], [0, 0, 1, 1], [], []>} : vector<2x512xf32>, vector<512x32xf32>, vector<2x32xf32> -> vector<2x32xf32>
    %14 = arith.addf %11, %13 : vector<2x32xf32>
    %c0_11 = arith.constant 0 : index
    %c0_12 = arith.constant 0 : index
    %15 = vector.load %arg8[%c0_11, %c0_12] : memref<2x32xf32, #tpu.memory_space<vmem>>, vector<2x32xf32>
    tpu.vector_store %arg8[%c0_11, %c0_12], %14 {strides = array<i32>} : memref<2x32xf32, #tpu.memory_space<vmem>>, vector<2x32xf32>,
    %c0_i32_13 = arith.constant 0 : i32
    %16 = arith.cmpi eq, %arg0, %c0_i32_13 : i32
    %17 = arith.extui %16 : i1 to i32
    %c0_i32_14 = arith.constant 0 : i32
    %18 = arith.cmpi ne, %17, %c0_i32_14 : i32
    scf.if %18 {
      %c0_15 = arith.constant 0 : index
      %c0_16 = arith.constant 0 : index
      %19 = vector.load %arg8[%c0_15, %c0_16] : memref<2x32xf32, #tpu.memory_space<vmem>>, vector<2x32xf32>
      %c0_17 = arith.constant 0 : index
      %c0_18 = arith.constant 0 : index
      %20 = vector.load %arg5[%c0_17, %c0_18] : memref<32x2xf32, #tpu.memory_space<vmem>>, vector<32x2xf32>
      %cst_19 = arith.constant dense<0.000000e+00> : vector<2x2xf32>
      %21 = tpu.matmul %19, %20, %cst_19 {dimension_numbers = #tpu.dot_dimension_numbers<[1], [0], [0], [1], [0, 0, 1, 1], [], []>} : vector<2x32xf32>, vector<32x2xf32>, vector<2x2xf32> -> vector<2x2xf32>
      %c0_20 = arith.constant 0 : index
      %c0_21 = arith.constant 0 : index
      %22 = vector.load %arg6[%c0_20, %c0_21] : memref<1x2xf32, #tpu.memory_space<vmem>>, vector<1x2xf32>
      %23 = vector.broadcast %22 : vector<1x2xf32> to vector<2x2xf32>
      %24 = arith.addf %21, %23 : vector<2x2xf32>
      %c0_22 = arith.constant 0 : index
      %c0_23 = arith.constant 0 : index
      %25 = vector.load %arg7[%c0_22, %c0_23] : memref<2x2xf32, #tpu.memory_space<vmem>>, vector<2x2xf32>
      tpu.vector_store %arg7[%c0_22, %c0_23], %24 {strides = array<i32>} : memref<2x2xf32, #tpu.memory_space<vmem>>, vector<2x2xf32>,
    } else {
    }
    return
  }
  func.func @transform_0(%arg0: i32) -> (i32, i32) {
    %c0_i32 = arith.constant 0 : i32
    %c0_i32_0 = arith.constant 0 : i32
    return %arg0, %c0_i32 : i32, i32
  }
  func.func @transform_1(%arg0: i32) -> (i32, i32) {
    %c0_i32 = arith.constant 0 : i32
    %c0_i32_0 = arith.constant 0 : i32
    %c0_i32_1 = arith.constant 0 : i32
    return %c0_i32, %c0_i32_0 : i32, i32
  }
  func.func @transform_2(%arg0: i32) -> (i32, i32) {
    %c0_i32 = arith.constant 0 : i32
    %c0_i32_0 = arith.constant 0 : i32
    %c0_i32_1 = arith.constant 0 : i32
    return %c0_i32, %c0_i32_0 : i32, i32
  }
  func.func @transform_3(%arg0: i32) -> (i32, i32) {
    %c0_i32 = arith.constant 0 : i32
    %c0_i32_0 = arith.constant 0 : i32
    return %c0_i32, %arg0 : i32, i32
  }
  func.func @transform_4(%arg0: i32) -> (i32, i32) {
    %c0_i32 = arith.constant 0 : i32
    %c0_i32_0 = arith.constant 0 : i32
    %c0_i32_1 = arith.constant 0 : i32
    return %c0_i32, %c0_i32_0 : i32, i32
  }
  func.func @transform_5(%arg0: i32) -> (i32, i32) {
    %c0_i32 = arith.constant 0 : i32
    %c0_i32_0 = arith.constant 0 : i32
    %c0_i32_1 = arith.constant 0 : i32
    return %c0_i32, %c0_i32_0 : i32, i32
  }
  func.func @transform_6(%arg0: i32) -> (i32, i32) {
    %c0_i32 = arith.constant 0 : i32
    %c0_i32_0 = arith.constant 0 : i32
    %c0_i32_1 = arith.constant 0 : i32
    return %c0_i32, %c0_i32_0 : i32, i32
  }
}

</mosaic_0001>

<bundles_post_ra>
// kernel: simple_snn_forward.1
= control target key start
LH: loop header
LB: loop body
LE: loop exit
PB: predicated region body
PF: predicated region fallthrough
CT: control target
= control target key end

     0   :  { %s2023_s0 = inlined_call_operand.vmem [shape: f32[512,128], index: 0, kind: input, shape index: {}]   ;;  %s2024_s1 = inlined_call_operand.vmem [shape: f32[128,32], index: 1, kind: input, shape index: {}]   ;;  %s2025_s2 = inlined_call_operand.vmem [shape: f32[1,32], index: 2, kind: input, shape index: {}]   ;;  %s2026_s3 = inlined_call_operand.vmem [shape: f32[2,512], index: 3, kind: input, shape index: {}]   ;;  %s2027_s4 = inlined_call_operand.vmem [shape: f32[32,2], index: 4, kind: input, shape index: {}]   ;;  %s2028_s5 = inlined_call_operand.vmem [shape: f32[1,2], index: 5, kind: input, shape index: {}]   ;;  %s2029_s6 = inlined_call_operand.hbm [shape: f32[2,2], index: 6, kind: output, shape index: {}]  }
   0x1   :  { %v109_v0 = vld [vmem:[%s2024_s1 + $0x78] sm:$0xff]  ;;  %v108_v1 = vld [vmem:[%s2024_s1 + $0x70] sm:$0xff]  ;;  %v107_v2 = vld [vmem:[%s2024_s1 + $0x68] sm:$0xff] }
   0x2   :  { %1252 = vmatprep.subr.mxu0 %v109_v0  ;;  %1391 = vmatprep.subr.mxu1 %v109_v0  ;;  %v106_v3 = vld [vmem:[%s2024_s1 + $0x60] sm:$0xff]  ;;  %v105_v5 = vld [vmem:[%s2024_s1 + $0x58] sm:$0xff]  ;;  %v104_v6 = vld [vmem:[%s2024_s1 + $0x50] sm:$0xff] }
   0x3   :  { %1253 = vmatpush3.msra.mxu0 %v109_v0  ;;  %1407 = vmatpush3.msra.mxu1 %v109_v0  ;;  %v30_v4 = vld [vmem:[%s2023_s0] sm:$0xff]  ;;  %v103_v7 = vld [vmem:[%s2024_s1 + $0x48] sm:$0xff]  ;;  %v101_v9 = vld [vmem:[%s2024_s1 + $0x38] sm:$0xff] }
   0x4   :  { %1254 = vmatprep.subr.mxu0 %v108_v1  ;;  %1392 = vmatprep.subr.mxu1 %v108_v1  ;;  %v102_v8 = vld [vmem:[%s2024_s1 + $0x40] sm:$0xff]  ;;  %v100_v10 = vld [vmem:[%s2024_s1 + $0x30] sm:$0xff]  ;;  %v99_v11 = vld [vmem:[%s2024_s1 + $0x28] sm:$0xff] }
   0x5   :  { %1255 = vmatpush3.msra.mxu0 %v108_v1  ;;  %1408 = vmatpush3.msra.mxu1 %v108_v1  ;;  %v98_v12 = vld [vmem:[%s2024_s1 + $0x20] sm:$0xff]  ;;  %v97_v13 = vld [vmem:[%s2024_s1 + $0x18] sm:$0xff]  ;;  %v96_v14 = vld [vmem:[%s2024_s1 + $0x10] sm:$0xff] }
   0x6   :  { %1256 = vmatprep.subr.mxu0 %v107_v2  ;;  %1393 = vmatprep.subr.mxu1 %v107_v2  ;;  %v95_v15 = vld [vmem:[%s2024_s1 + $0x8] sm:$0xff] }
   0x7   :  { %1257 = vmatpush3.msra.mxu0 %v107_v2  ;;  %1284 = vmatprep.mubr.f32.mxu0 %v30_v4 }
   0x8   :  { %1258 = vmatprep.subr.mxu0 %v106_v3  ;;  %1409 = vmatpush3.msra.mxu1 %v107_v2 }
   0x9   :  { %1259 = vmatpush3.msra.mxu0 %v106_v3  ;;  %1394 = vmatprep.subr.mxu1 %v106_v3 }
   0xa   :  { %1260 = vmatprep.subr.mxu0 %v105_v5  ;;  %1410 = vmatpush3.msra.mxu1 %v106_v3 }
   0xb   :  { %1261 = vmatpush3.msra.mxu0 %v105_v5  ;;  %1395 = vmatprep.subr.mxu1 %v105_v5 }
   0xc   :  { %1262 = vmatprep.subr.mxu0 %v104_v6  ;;  %1411 = vmatpush3.msra.mxu1 %v105_v5 }
   0xd   :  { %1263 = vmatpush3.msra.mxu0 %v104_v6  ;;  %1396 = vmatprep.subr.mxu1 %v104_v6 }
   0xe   :  { %1264 = vmatprep.subr.mxu0 %v103_v7  ;;  %1412 = vmatpush3.msra.mxu1 %v104_v6 }
   0xf   :  { %1265 = vmatpush3.msra.mxu0 %v103_v7  ;;  %1397 = vmatprep.subr.mxu1 %v103_v7 }
  0x10   :  { %1266 = vmatprep.subr.mxu0 %v102_v8  ;;  %1413 = vmatpush3.msra.mxu1 %v103_v7 }
  0x11   :  { %1267 = vmatpush3.msra.mxu0 %v102_v8  ;;  %1398 = vmatprep.subr.mxu1 %v102_v8 }
  0x12   :  { %1268 = vmatprep.subr.mxu0 %v101_v9  ;;  %1414 = vmatpush3.msra.mxu1 %v102_v8 }
  0x13   :  { %1269 = vmatpush3.msra.mxu0 %v101_v9  ;;  %1399 = vmatprep.subr.mxu1 %v101_v9 }
  0x14   :  { %1270 = vmatprep.subr.mxu0 %v100_v10  ;;  %1415 = vmatpush3.msra.mxu1 %v101_v9 }
  0x15   :  { %1271 = vmatpush3.msra.mxu0 %v100_v10  ;;  %1400 = vmatprep.subr.mxu1 %v100_v10 }
  0x16   :  { %1272 = vmatprep.subr.mxu0 %v99_v11  ;;  %1416 = vmatpush3.msra.mxu1 %v100_v10 }
  0x17   :  { %1273 = vmatpush3.msra.mxu0 %v99_v11  ;;  %1401 = vmatprep.subr.mxu1 %v99_v11 }
  0x18   :  { %1274 = vmatprep.subr.mxu0 %v98_v12  ;;  %1417 = vmatpush3.msra.mxu1 %v99_v11 }
  0x19   :  { %1275 = vmatpush3.msra.mxu0 %v98_v12  ;;  %1402 = vmatprep.subr.mxu1 %v98_v12 }
  0x1a   :  { %1276 = vmatprep.subr.mxu0 %v97_v13  ;;  %1418 = vmatpush3.msra.mxu1 %v98_v12 }
  0x1b   :  { %1277 = vmatpush3.msra.mxu0 %v97_v13  ;;  %1403 = vmatprep.subr.mxu1 %v97_v13 }
  0x1c   :  { %11 = vsyncpa [#allocation4], 0  ;;  %1278 = vmatprep.subr.mxu0 %v96_v14  ;;  %1419 = vmatpush3.msra.mxu1 %v97_v13  ;;  %v94_v16 = vld [vmem:[%s2024_s1] sm:$0xff]  ;;  %v31_v17 = vld [vmem:[%s2023_s0 + $0x8] sm:$0xff] }
  0x1d   :  { %1279 = vmatpush3.msra.mxu0 %v96_v14  ;;  %1404 = vmatprep.subr.mxu1 %v96_v14  ;;  %v32_v18 = vld [vmem:[%s2023_s0 + $0x10] sm:$0xff]  ;;  %v74_v19 = vld [vmem:[%s2023_s0 + $0x160] sm:$0xff]  ;;  %v75_v20 = vld [vmem:[%s2023_s0 + $0x168] sm:$0xff] }
  0x1e   :  { %1280 = vmatprep.subr.mxu0 %v95_v15  ;;  %1420 = vmatpush3.msra.mxu1 %v96_v14  ;;  %v76_v21 = vld [vmem:[%s2023_s0 + $0x170] sm:$0xff]  ;;  %v33_v22 = vld [vmem:[%s2023_s0 + $0x18] sm:$0xff]  ;;  %v34_v23 = vld [vmem:[%s2023_s0 + $0x20] sm:$0xff] }
  0x1f   :  { %1281 = vmatpush3.msra.mxu0 %v95_v15  ;;  %1405 = vmatprep.subr.mxu1 %v95_v15  ;;  %v77_v24 = vld [vmem:[%s2023_s0 + $0x178] sm:$0xff]  ;;  %v78_v25 = vld [vmem:[%s2023_s0 + $0x180] sm:$0xff]  ;;  %v35_v26 = vld [vmem:[%s2023_s0 + $0x28] sm:$0xff] }
  0x20   :  { %1282 = vmatprep.subr.mxu0 %v94_v16  ;;  %1421 = vmatpush3.msra.mxu1 %v95_v15  ;;  %v36_v27 = vld [vmem:[%s2023_s0 + $0x30] sm:$0xff]  ;;  %v79_v28 = vld [vmem:[%s2023_s0 + $0x188] sm:$0xff]  ;;  %v37_v30 = vld [vmem:[%s2023_s0 + $0x38] sm:$0xff] }
  0x21   :  { %1283 = vmatpush3.msra.mxu0 %v94_v16  ;;  %1406 = vmatprep.subr.mxu1 %v94_v16  ;;  %v80_v29 = vld [vmem:[%s2023_s0 + $0x190] sm:$0xff]  ;;  %v38_v31 = vld [vmem:[%s2023_s0 + $0x40] sm:$0xff]  ;;  %v81_v32 = vld [vmem:[%s2023_s0 + $0x198] sm:$0xff] }
  0x22   :  { %1285 = vmatmul.mubr.f32.vlgmr.msra.gmra.mxu0 %v31_v17  ;;  %1422 = vmatpush3.msra.mxu1 %v94_v16  ;;  %v82_v33 = vld [vmem:[%s2023_s0 + $0x1a0] sm:$0xff]  ;;  %v39_v34 = vld [vmem:[%s2023_s0 + $0x48] sm:$0xff]  ;;  %v40_v35 = vld [vmem:[%s2023_s0 + $0x50] sm:$0xff]  ;;  %v1451_v16 = vmov 1983009808  }
  0x23   :  { %1287 = vmatprep.mubr.f32.mxu0 %v32_v18  ;;  %1350 = vmatprep.mubr.f32.mxu1 %v74_v19  ;;  %v83_v36 = vld [vmem:[%s2023_s0 + $0x1a8] sm:$0xff]  ;;  %v84_v37 = vld [vmem:[%s2023_s0 + $0x1b0] sm:$0xff]  ;;  %v41_v38 = vld [vmem:[%s2023_s0 + $0x58] sm:$0xff]  ;;  %v699_v17 = vunpack.c.l.s4 %v1451_v16  ;;  %v701_v18 = vlaneseq }
  0x24   :  { %1351 = vmatmul.mubr.f32.vlgmr.msra.gmra.mxu1 %v75_v20  ;;  %v42_v39 = vld [vmem:[%s2023_s0 + $0x60] sm:$0xff]  ;;  %v85_v40 = vld [vmem:[%s2023_s0 + $0x1b8] sm:$0xff]  ;;  %v43_v42 = vld [vmem:[%s2023_s0 + $0x68] sm:$0xff] }
  0x25   :  { %1353 = vmatprep.mubr.f32.mxu1 %v76_v21  ;;  %v86_v41 = vld [vmem:[%s2023_s0 + $0x1c0] sm:$0xff]  ;;  %v44_v43 = vld [vmem:[%s2023_s0 + $0x70] sm:$0xff]  ;;  %v87_v44 = vld [vmem:[%s2023_s0 + $0x1c8] sm:$0xff]  ;;  %v700_v19 = vunpack.c.0.s8 %v699_v17  ;;  %v702_v20 = vshrl.u32 %v701_v18, 7 }
  0x26   :  { %1288 = vmatmul.mubr.f32.gmra.mxu0 %v33_v22  ;;  %v88_v45 = vld [vmem:[%s2023_s0 + $0x1d0] sm:$0xff]  ;;  %v45_v46 = vld [vmem:[%s2023_s0 + $0x78] sm:$0xff]  ;;  %v46_v47 = vld [vmem:[%s2023_s0 + $0x80] sm:$0xff] }
  0x27   :  { %1290 = vmatprep.mubr.f32.mxu0 %v34_v23  ;;  %v89_v48 = vld [vmem:[%s2023_s0 + $0x1d8] sm:$0xff]  ;;  %v90_v49 = vld [vmem:[%s2023_s0 + $0x1e0] sm:$0xff]  ;;  %v47_v50 = vld [vmem:[%s2023_s0 + $0x88] sm:$0xff]  ;;  %v703_v21 = vsub.s32 %v700_v19, %v702_v20 }
  0x28   :  { %1354 = vmatmul.mubr.f32.gmra.mxu1 %v77_v24  ;;  %v48_v51 = vld [vmem:[%s2023_s0 + $0x90] sm:$0xff]  ;;  %v91_v52 = vld [vmem:[%s2023_s0 + $0x1e8] sm:$0xff]  ;;  %v49_v54 = vld [vmem:[%s2023_s0 + $0x98] sm:$0xff] }
  0x29   :  { %1356 = vmatprep.mubr.f32.mxu1 %v78_v25  ;;  %v92_v53 = vld [vmem:[%s2023_s0 + $0x1f0] sm:$0xff]  ;;  %v50_v55 = vld [vmem:[%s2023_s0 + $0xa0] sm:$0xff]  ;;  %v93_v56 = vld [vmem:[%s2023_s0 + $0x1f8] sm:$0xff] }
  0x2a   :  { %1291 = vmatmul.mubr.f32.gmra.mxu0 %v35_v26  ;;  %v51_v57 = vld [vmem:[%s2023_s0 + $0xa8] sm:$0xff]  ;;  %v52_v58 = vld [vmem:[%s2023_s0 + $0xb0] sm:$0xff]  ;;  %v53_v59 = vld [vmem:[%s2023_s0 + $0xb8] sm:$0xff] }
  0x2b   :  { %1293 = vmatprep.mubr.f32.mxu0 %v36_v27  ;;  %v54_v60 = vld [vmem:[%s2023_s0 + $0xc0] sm:$0xff]  ;;  %v55_v61 = vld [vmem:[%s2023_s0 + $0xc8] sm:$0xff]  ;;  %v56_v62 = vld [vmem:[%s2023_s0 + $0xd0] sm:$0xff] }
  0x2c   :  { %1357 = vmatmul.mubr.f32.gmra.mxu1 %v79_v28  ;;  %v57_v63 = vld [vmem:[%s2023_s0 + $0xd8] sm:$0xff]  ;;  %v58_v0 = vld [vmem:[%s2023_s0 + $0xe0] sm:$0xff]  ;;  %v59_v1 = vld [vmem:[%s2023_s0 + $0xe8] sm:$0xff] }
  0x2d   :  { %1359 = vmatprep.mubr.f32.mxu1 %v80_v29  ;;  %v60_v2 = vld [vmem:[%s2023_s0 + $0xf0] sm:$0xff]  ;;  %v61_v3 = vld [vmem:[%s2023_s0 + $0xf8] sm:$0xff]  ;;  %v62_v4 = vld [vmem:[%s2023_s0 + $0x100] sm:$0xff] }
  0x2e   :  { %1294 = vmatmul.mubr.f32.gmra.mxu0 %v37_v30  ;;  %v63_v5 = vld [vmem:[%s2023_s0 + $0x108] sm:$0xff]  ;;  %v64_v6 = vld [vmem:[%s2023_s0 + $0x110] sm:$0xff]  ;;  %v65_v7 = vld [vmem:[%s2023_s0 + $0x118] sm:$0xff] }
  0x2f   :  { %1296 = vmatprep.mubr.f32.mxu0 %v38_v31  ;;  %v66_v8 = vld [vmem:[%s2023_s0 + $0x120] sm:$0xff]  ;;  %v67_v9 = vld [vmem:[%s2023_s0 + $0x128] sm:$0xff]  ;;  %v68_v10 = vld [vmem:[%s2023_s0 + $0x130] sm:$0xff] }
  0x30   :  { %1360 = vmatmul.mubr.f32.gmra.mxu1 %v81_v32  ;;  %v69_v11 = vld [vmem:[%s2023_s0 + $0x138] sm:$0xff]  ;;  %v70_v12 = vld [vmem:[%s2023_s0 + $0x140] sm:$0xff]  ;;  %v71_v13 = vld [vmem:[%s2023_s0 + $0x148] sm:$0xff] }
  0x31   :  { %1362 = vmatprep.mubr.f32.mxu1 %v82_v33  ;;  %v72_v14 = vld [vmem:[%s2023_s0 + $0x150] sm:$0xff]  ;;  %v73_v15 = vld [vmem:[%s2023_s0 + $0x158] sm:$0xff]  ;;  %v695_v22 = vld [vmem:[%s2026_s3] sm:$0xff] }
  0x32   :  { %1297 = vmatmul.mubr.f32.gmra.mxu0 %v39_v34  ;;  %v1734_v23 = vrot.slane %v695_v22, %v703_v21  ;;  %v697_v25 = vcombine.high %v695_v22, %v695_v22 }
  0x33   :  { %1299 = vmatprep.mubr.f32.mxu0 %v40_v35 }
  0x34   :  { %1363 = vmatmul.mubr.f32.gmra.mxu1 %v83_v36  ;;  %v712_v24 = vcombine.high %v1734_v23, %v1734_v23  ;;  %v1738_v26 = vrot.slane %v697_v25, %v703_v21 }
  0x35   :  { %1365 = vmatprep.mubr.f32.mxu1 %v84_v37 }
  0x36   :  { %1300 = vmatmul.mubr.f32.gmra.mxu0 %v41_v38 }
  0x37   :  { %1302 = vmatprep.mubr.f32.mxu0 %v42_v39 }
  0x38   :  { %1366 = vmatmul.mubr.f32.gmra.mxu1 %v85_v40 }
  0x39   :  { %1368 = vmatprep.mubr.f32.mxu1 %v86_v41 }
  0x3a   :  { %1303 = vmatmul.mubr.f32.gmra.mxu0 %v43_v42 }
  0x3b   :  { %1305 = vmatprep.mubr.f32.mxu0 %v44_v43 }
  0x3c   :  { %1369 = vmatmul.mubr.f32.gmra.mxu1 %v87_v44 }
  0x3d   :  { %1371 = vmatprep.mubr.f32.mxu1 %v88_v45 }
  0x3e   :  { %1306 = vmatmul.mubr.f32.gmra.mxu0 %v45_v46 }
  0x3f   :  { %1308 = vmatprep.mubr.f32.mxu0 %v46_v47 }
  0x40   :  { %1372 = vmatmul.mubr.f32.gmra.mxu1 %v89_v48 }
  0x41   :  { %1374 = vmatprep.mubr.f32.mxu1 %v90_v49 }
  0x42   :  { %1309 = vmatmul.mubr.f32.gmra.mxu0 %v47_v50 }
  0x43   :  { %1311 = vmatprep.mubr.f32.mxu0 %v48_v51 }
  0x44   :  { %1375 = vmatmul.mubr.f32.gmra.mxu1 %v91_v52 }
  0x45   :  { %1377 = vmatprep.mubr.f32.mxu1 %v92_v53 }
  0x46   :  { %1312 = vmatmul.mubr.f32.gmra.mxu0 %v49_v54 }
  0x47   :  { %1314 = vmatprep.mubr.f32.mxu0 %v50_v55 }
  0x48   :  { %1378 = vmatmul.mubr.f32.gmra.mxu1 %v93_v56 }
  0x49   :  { %782 = vmatprep.mubr.f32.mxu1 %v712_v24 }
  0x4a   :  { %1315 = vmatmul.mubr.f32.gmra.mxu0 %v51_v57 }
  0x4b   :  { %1317 = vmatprep.mubr.f32.mxu0 %v52_v58 }
  0x4e   :  { %1318 = vmatmul.mubr.f32.gmra.mxu0 %v53_v59 }
  0x4f   :  { %1320 = vmatprep.mubr.f32.mxu0 %v54_v60 }
  0x52   :  { %1321 = vmatmul.mubr.f32.gmra.mxu0 %v55_v61 }
  0x53   :  { %1323 = vmatprep.mubr.f32.mxu0 %v56_v62 }
  0x56   :  { %1324 = vmatmul.mubr.f32.gmra.mxu0 %v57_v63 }
  0x57   :  { %1326 = vmatprep.mubr.f32.mxu0 %v58_v0 }
  0x5a   :  { %1327 = vmatmul.mubr.f32.gmra.mxu0 %v59_v1 }
  0x5b   :  { %1329 = vmatprep.mubr.f32.mxu0 %v60_v2 }
  0x5e   :  { %1330 = vmatmul.mubr.f32.gmra.mxu0 %v61_v3 }
  0x5f   :  { %1332 = vmatprep.mubr.f32.mxu0 %v62_v4  ;;  %v1801_v4 = vld [vmem:[%s2025_s2] ss:$0 sm:$0xff] }
  0x62   :  { %1333 = vmatmul.mubr.f32.gmra.mxu0 %v63_v5 }
  0x63   :  { %1335 = vmatprep.mubr.f32.mxu0 %v64_v6 }
  0x66   :  { %1336 = vmatmul.mubr.f32.gmra.mxu0 %v65_v7 }
  0x67   :  { %1338 = vmatprep.mubr.f32.mxu0 %v66_v8  ;;  %v1452_v8 = vmov 1.0  }
  0x6a   :  { %1339 = vmatmul.mubr.f32.gmra.mxu0 %v67_v9 }
  0x6b   :  { %1341 = vmatprep.mubr.f32.mxu0 %v68_v10 }
  0x6e   :  { %1342 = vmatmul.mubr.f32.gmra.mxu0 %v69_v11 }
  0x6f   :  { %1344 = vmatprep.mubr.f32.mxu0 %v70_v12 }
  0x72   :  { %1345 = vmatmul.mubr.f32.gmra.mxu0 %v71_v13 }
  0x73   :  { %1347 = vmatprep.mubr.f32.mxu0 %v72_v14 }
  0x76   :  { %1348 = vmatmul.mubr.f32.gmra.mxu0 %v73_v15 }
  0xe2   :  { %v1740_v27 = vpop.f32.mrf.mxu0 }
  0xe4   :  { %v1742_v28 = vpop.f32.mrf.mxu0  ;;  %v1758_v36 = vpop.f32.mrf.mxu1 }
  0xe6   :  { %v1744_v29 = vpop.f32.mrf.mxu0  ;;  %v1762_v39 = vpop.f32.mrf.mxu1 }
  0xe8   :  { %v1746_v30 = vpop.f32.mrf.mxu0  ;;  %v1766_v42 = vpop.f32.mrf.mxu1 }
  0xea   :  { %v1748_v31 = vpop.f32.mrf.mxu0  ;;  %v1768_v45 = vpop.f32.mrf.mxu1 }
  0xec   :  { %v1750_v32 = vpop.f32.mrf.mxu0  ;;  %v1772_v48 = vpop.f32.mrf.mxu1 }
  0xee   :  { %v1752_v33 = vpop.f32.mrf.mxu0  ;;  %v1778_v51 = vpop.f32.mrf.mxu1 }
  0xf0   :  { %v1754_v34 = vpop.f32.mrf.mxu0  ;;  %v1784_v54 = vpop.f32.mrf.mxu1 }
  0xf2   :  { %v1756_v35 = vpop.f32.mrf.mxu0  ;;  %v1788_v57 = vpop.f32.mrf.mxu1 }
  0xf3   :  { %vm511_vm13 = vcmp.ge.f32.partialorder %v1756_v35, %v1801_v4 }
  0xf4   :  { %v1760_v37 = vpop.f32.mrf.mxu0  ;;  %v1792_v60 = vpop.f32.mrf.mxu1 }
  0xf5   :  { %vm510_vm15 = vcmp.ge.f32.partialorder %v1760_v37, %v1801_v4 }
  0xf6   :  { %v1301_v38 = vpop.f32.mrf.mxu0  ;;  %v1794_v63 = vpop.f32.mrf.mxu1 }
  0xf7   :  { %vm513_vm9 = vcmp.ge.f32.partialorder %v1301_v38, %v1801_v4 }
  0xf8   :  { %v1764_v40 = vpop.f32.mrf.mxu0  ;;  %v1796_v2 = vpop.f32.mrf.mxu1 }
  0xf9   :  { %vm512_vm11 = vcmp.ge.f32.partialorder %v1764_v40, %v1801_v4 }
  0xfa   :  { %v1304_v41 = vpop.f32.mrf.mxu0  ;;  %v1803_v6 = vpop.f32.mrf.mxu1 }
  0xfb   :  { %vm515_vm5 = vcmp.ge.f32.partialorder %v1304_v41, %v1801_v4 }
  0xfc   :  { %v236_v43 = vpop.f32.mrf.mxu0  ;;  %v1812_v9 = vpop.f32.mrf.mxu1 }
  0xfd   :  { %vm514_vm7 = vcmp.ge.f32.partialorder %v236_v43, %v1801_v4 }
  0xfe   :  { %v1307_v44 = vpop.f32.mrf.mxu0  ;;  %v1826_v12 = vpop.f32.mrf.mxu1 }
  0xff   :  { %vm517_vm1 = vcmp.ge.f32.partialorder %v1307_v44, %v1801_v4 }
 0x100   :  { %v246_v46 = vpop.f32.mrf.mxu0  ;;  %v1841_v15 = vpop.f32.mrf.mxu1 }
 0x101   :  { %vm516_vm3 = vcmp.ge.f32.partialorder %v246_v46, %v1801_v4 }
 0x102   :  { %v1770_v47 = vpop.f32.mrf.mxu0  ;;  %v1855_v17 = vpop.f32.mrf.mxu1 }
 0x104   :  { %v1774_v49 = vpop.f32.mrf.mxu0  ;;  %v1376_v19 = vpop.f32.mrf.mxu1 }
 0x106   :  { %v1776_v50 = vpop.f32.mrf.mxu0  ;;  %v476_v21 = vpop.f32.mrf.mxu1 }
 0x108   :  { %v1780_v52 = vpop.f32.mrf.mxu0  ;;  %v1379_v24 = vpop.f32.mrf.mxu1 }
 0x10a   :  { %v1782_v53 = vpop.f32.mrf.mxu0 }
 0x10c   :  { %v1786_v55 = vpop.f32.mrf.mxu0 }
 0x10e   :  { %v1319_v56 = vpop.f32.mrf.mxu0 }
 0x110   :  { %v1790_v58 = vpop.f32.mrf.mxu0 }
 0x112   :  { %v1322_v59 = vpop.f32.mrf.mxu0 }
 0x113   :  { %vm527_vm12 = vcmp.ge.f32.partialorder %v1322_v59, %v1801_v4 }
 0x114   :  { %v296_v61 = vpop.f32.mrf.mxu0 }
 0x115   :  { %vm526_vm14 = vcmp.ge.f32.partialorder %v296_v61, %v1801_v4 }
 0x116   :  { %v1325_v62 = vpop.f32.mrf.mxu0 }
 0x117   :  { %vm529_vm8 = vcmp.ge.f32.partialorder %v1325_v62, %v1801_v4 }
 0x118   :  { %v306_v0 = vpop.f32.mrf.mxu0 }
 0x119   :  { %vm528_vm10 = vcmp.ge.f32.partialorder %v306_v0, %v1801_v4 }
 0x11a   :  { %v1328_v1 = vpop.f32.mrf.mxu0 }
 0x11b   :  { %vm531_vm4 = vcmp.ge.f32.partialorder %v1328_v1, %v1801_v4 }
 0x11c   :  { %v316_v3 = vpop.f32.mrf.mxu0 }
 0x11d   :  { %vm530_vm6 = vcmp.ge.f32.partialorder %v316_v3, %v1801_v4 }
 0x11e   :  { %v1331_v5 = vpop.f32.mrf.mxu0 }
 0x11f   :  { %vm533_vm0 = vcmp.ge.f32.partialorder %v1331_v5, %v1801_v4 }
 0x120   :  { %v326_v7 = vpop.f32.mrf.mxu0  ;;  %1177 = vmatprep.subr.msk.mxu1 %vm533_vm0, %v1452_v8  ;;  %vm525_vm0 = vcmp.ge.f32.partialorder %v1319_v56, %v1801_v4 }
 0x121   :  { %vm532_vm2 = vcmp.ge.f32.partialorder %v326_v7, %v1801_v4  ;;  %1178 = vmatpush3.msk.msra.mxu1 %vm517_vm1, %v1452_v8  ;;  %vm509_vm1 = vcmp.ge.f32.partialorder %v1752_v33, %v1801_v4  ;;  %v867_v33 = vld [vmem:[%s2027_s4 + $0x10] sm:$0xff] }
 0x122   :  { %1179 = vmatprep.subr.msk.mxu1 %vm532_vm2, %v1452_v8  ;;  %v1814_v10 = vpop.f32.mrf.mxu0  ;;  %vm524_vm2 = vcmp.ge.f32.partialorder %v1790_v58, %v1801_v4 }
 0x123   :  { %1180 = vmatpush3.msk.msra.mxu1 %vm516_vm3, %v1452_v8  ;;  %vm508_vm3 = vcmp.ge.f32.partialorder %v1754_v34, %v1801_v4  ;;  %v865_v34 = vld [vmem:[%s2027_s4] sm:$0xff] }
 0x124   :  { %1181 = vmatprep.subr.msk.mxu1 %vm531_vm4, %v1452_v8  ;;  %v1820_v11 = vpop.f32.mrf.mxu0  ;;  %vm523_vm4 = vcmp.ge.f32.partialorder %v1782_v53, %v1801_v4 }
 0x125   :  { %1182 = vmatpush3.msk.msra.mxu1 %vm515_vm5, %v1452_v8  ;;  %vm507_vm5 = vcmp.ge.f32.partialorder %v1748_v31, %v1801_v4  ;;  %v1453_v31 = vmov 0.0  }
 0x126   :  { %1183 = vmatprep.subr.msk.mxu1 %vm530_vm6, %v1452_v8  ;;  %v1828_v13 = vpop.f32.mrf.mxu0  ;;  %vm522_vm6 = vcmp.ge.f32.partialorder %v1786_v55, %v1801_v4 }
 0x127   :  { %1184 = vmatpush3.msk.msra.mxu1 %vm514_vm7, %v1452_v8  ;;  %vm506_vm7 = vcmp.ge.f32.partialorder %v1750_v32, %v1801_v4  ;;  %v868_v32 = vld [vmem:[%s2027_s4 + $0x18] sm:$0xff] }
 0x128   :  { %1185 = vmatprep.subr.msk.mxu1 %vm529_vm8, %v1452_v8  ;;  %v1834_v14 = vpop.f32.mrf.mxu0  ;;  %vm521_vm8 = vcmp.ge.f32.partialorder %v1776_v50, %v1801_v4 }
 0x129   :  { %1186 = vmatpush3.msk.msra.mxu1 %vm513_vm9, %v1452_v8  ;;  %vm505_vm9 = vcmp.ge.f32.partialorder %v1744_v29, %v1801_v4  ;;  %v713_v29 = vcombine.high %v1738_v26, %v1738_v26 }
 0x12a   :  { %1187 = vmatprep.subr.msk.mxu1 %vm528_vm10, %v1452_v8  ;;  %v1845_v16 = vpop.f32.mrf.mxu0  ;;  %vm520_vm10 = vcmp.ge.f32.partialorder %v1780_v52, %v1801_v4 }
 0x12b   :  { %1188 = vmatpush3.msk.msra.mxu1 %vm512_vm11, %v1452_v8  ;;  %vm504_vm11 = vcmp.ge.f32.partialorder %v1746_v30, %v1801_v4  ;;  %v486_v30 = vpop.f32.mrf.mxu1 }
 0x12c   :  { %1189 = vmatprep.subr.msk.mxu1 %vm527_vm12, %v1452_v8  ;;  %v1859_v18 = vpop.f32.mrf.mxu0  ;;  %vm519_vm12 = vcmp.ge.f32.partialorder %v1770_v47, %v1801_v4 }
 0x12d   :  { %1190 = vmatpush3.msk.msra.mxu1 %vm511_vm13, %v1452_v8  ;;  %vm503_vm13 = vcmp.ge.f32.partialorder %v1740_v27, %v1801_v4 }
 0x12e   :  { %1191 = vmatprep.subr.msk.mxu1 %vm526_vm14, %v1452_v8  ;;  %v1873_v20 = vpop.f32.mrf.mxu0  ;;  %vm518_vm14 = vcmp.ge.f32.partialorder %v1774_v49, %v1801_v4 }
 0x12f   :  { %1192 = vmatpush3.msk.msra.mxu1 %vm510_vm15, %v1452_v8  ;;  %vm565_vm15 = vcmp.ge.f32.partialorder %v1379_v24, %v1801_v4 }
 0x130   :  { %1193 = vmatprep.subr.msk.mxu1 %vm525_vm0, %v1452_v8  ;;  %v1887_v22 = vpop.f32.mrf.mxu0  ;;  %vm502_vm0 = vcmp.ge.f32.partialorder %v1742_v28, %v1801_v4 }
 0x131   :  { %1194 = vmatpush3.msk.msra.mxu1 %vm509_vm1, %v1452_v8  ;;  %vm549_vm1 = vcmp.ge.f32.partialorder %v1766_v42, %v1801_v4 }
 0x132   :  { %1195 = vmatprep.subr.msk.mxu1 %vm524_vm2, %v1452_v8  ;;  %v1346_v25 = vpop.f32.mrf.mxu0  ;;  %vm564_vm2 = vcmp.ge.f32.partialorder %v486_v30, %v1801_v4 }
 0x133   :  { %1196 = vmatpush3.msk.msra.mxu1 %vm508_vm3, %v1452_v8  ;;  %vm548_vm3 = vcmp.ge.f32.partialorder %v1768_v45, %v1801_v4  ;;  %v1095_v45 = vld [vmem:[%s2028_s5] ss:$0 sm:$0xff] }
 0x134   :  { %1197 = vmatprep.subr.msk.mxu1 %vm523_vm4, %v1452_v8  ;;  %v376_v27 = vpop.f32.mrf.mxu0  ;;  %vm563_vm4 = vcmp.ge.f32.partialorder %v1376_v19, %v1801_v4 }
 0x135   :  { %1198 = vmatpush3.msk.msra.mxu1 %vm507_vm5, %v1452_v8  ;;  %vm547_vm5 = vcmp.ge.f32.partialorder %v1758_v36, %v1801_v4 }
 0x136   :  { %1199 = vmatprep.subr.msk.mxu1 %vm522_vm6, %v1452_v8  ;;  %v1349_v28 = vpop.f32.mrf.mxu0  ;;  %vm562_vm6 = vcmp.ge.f32.partialorder %v476_v21, %v1801_v4 }
 0x137   :  { %1200 = vmatpush3.msk.msra.mxu1 %vm506_vm7, %v1452_v8  ;;  %vm546_vm7 = vcmp.ge.f32.partialorder %v1762_v39, %v1801_v4 }
 0x138   :  { %1201 = vmatprep.subr.msk.mxu1 %vm521_vm8, %v1452_v8  ;;  %vm545_vm8 = vcmp.ge.f32.partialorder %v1349_v28, %v1801_v4 }
 0x139   :  { %1202 = vmatpush3.msk.msra.mxu1 %vm505_vm9, %v1452_v8  ;;  %vm561_vm9 = vcmp.ge.f32.partialorder %v1841_v15, %v1801_v4 }
 0x13a   :  { %1203 = vmatprep.subr.msk.mxu1 %vm520_vm10, %v1452_v8  ;;  %vm560_vm10 = vcmp.ge.f32.partialorder %v1855_v17, %v1801_v4 }
 0x13b   :  { %1204 = vmatpush3.msk.msra.mxu1 %vm504_vm11, %v1452_v8 }
 0x13c   :  { %1205 = vmatprep.subr.msk.mxu1 %vm519_vm12, %v1452_v8  ;;  %vm559_vm12 = vcmp.ge.f32.partialorder %v1812_v9, %v1801_v4 }
 0x13d   :  { %1206 = vmatpush3.msk.msra.mxu1 %vm503_vm13, %v1452_v8  ;;  %vm543_vm13 = vcmp.ge.f32.partialorder %v1346_v25, %v1801_v4 }
 0x13e   :  { %1207 = vmatprep.subr.msk.mxu1 %vm518_vm14, %v1452_v8  ;;  %vm558_vm14 = vcmp.ge.f32.partialorder %v1826_v12, %v1801_v4 }
 0x13f   :  { %1208 = vmatpush3.msk.msra.mxu1 %vm502_vm0, %v1452_v8  ;;  %vm557_vm0 = vcmp.ge.f32.partialorder %v1796_v2, %v1801_v4 }
 0x140   :  { %1212 = vmatprep.subr.msk.mxu1 %vm565_vm15, %v1452_v8  ;;  %783 = vmatmul.mubr.f32.vlgmr.msra.gmra.mxu1 %v1734_v23  ;;  %v386_v23 = vpop.f32.mrf.mxu0  ;;  %vm542_vm15 = vcmp.ge.f32.partialorder %v376_v27, %v1801_v4 }
 0x141   :  { %1213 = vmatpush3.msk.msra.mxu1 %vm549_vm1, %v1452_v8  ;;  %852 = vmatprep.mubr.f32.mxu1 %v713_v29  ;;  %vm544_vm11 = vcmp.ge.f32.partialorder %v386_v23, %v1801_v4  ;;  %vm541_vm1 = vcmp.ge.f32.partialorder %v1873_v20, %v1801_v4 }
 0x142   :  { %1214 = vmatprep.subr.msk.mxu1 %vm564_vm2, %v1452_v8  ;;  %vm556_vm2 = vcmp.ge.f32.partialorder %v1803_v6, %v1801_v4 }
 0x143   :  { %1215 = vmatpush3.msk.msra.mxu1 %vm548_vm3, %v1452_v8  ;;  %vm540_vm3 = vcmp.ge.f32.partialorder %v1887_v22, %v1801_v4 }
 0x144   :  { %1216 = vmatprep.subr.msk.mxu1 %vm563_vm4, %v1452_v8  ;;  %vm555_vm4 = vcmp.ge.f32.partialorder %v1792_v60, %v1801_v4 }
 0x145   :  { %1217 = vmatpush3.msk.msra.mxu1 %vm547_vm5, %v1452_v8  ;;  %vm539_vm5 = vcmp.ge.f32.partialorder %v1845_v16, %v1801_v4 }
 0x146   :  { %1218 = vmatprep.subr.msk.mxu1 %vm562_vm6, %v1452_v8  ;;  %vm554_vm6 = vcmp.ge.f32.partialorder %v1794_v63, %v1801_v4 }
 0x147   :  { %1219 = vmatpush3.msk.msra.mxu1 %vm546_vm7, %v1452_v8  ;;  %vm538_vm7 = vcmp.ge.f32.partialorder %v1859_v18, %v1801_v4 }
 0x148   :  { %1220 = vmatprep.subr.msk.mxu1 %vm561_vm9, %v1452_v8  ;;  %vm537_vm9 = vcmp.ge.f32.partialorder %v1828_v13, %v1801_v4 }
 0x149   :  { %1221 = vmatpush3.msk.msra.mxu1 %vm545_vm8, %v1452_v8  ;;  %vm553_vm8 = vcmp.ge.f32.partialorder %v1784_v54, %v1801_v4 }
 0x14a   :  { %1222 = vmatprep.subr.msk.mxu1 %vm560_vm10, %v1452_v8  ;;  %vm552_vm10 = vcmp.ge.f32.partialorder %v1788_v57, %v1801_v4 }
 0x14b   :  { %1223 = vmatpush3.msk.msra.mxu1 %vm544_vm11, %v1452_v8  ;;  %vm536_vm11 = vcmp.ge.f32.partialorder %v1834_v14, %v1801_v4 }
 0x14c   :  { %1224 = vmatprep.subr.msk.mxu1 %vm559_vm12, %v1452_v8  ;;  %vm551_vm12 = vcmp.ge.f32.partialorder %v1772_v48, %v1801_v4 }
 0x14d   :  { %1225 = vmatpush3.msk.msra.mxu1 %vm543_vm13, %v1452_v8  ;;  %vm535_vm13 = vcmp.ge.f32.partialorder %v1814_v10, %v1801_v4 }
 0x14e   :  { %1226 = vmatprep.subr.msk.mxu1 %vm558_vm14, %v1452_v8  ;;  %vm550_vm14 = vcmp.ge.f32.partialorder %v1778_v51, %v1801_v4 }
 0x14f   :  { %1227 = vmatpush3.msk.msra.mxu1 %vm542_vm15, %v1452_v8  ;;  %vm534_vm15 = vcmp.ge.f32.partialorder %v1820_v11, %v1801_v4 }
 0x150   :  { %1228 = vmatprep.subr.msk.mxu1 %vm557_vm0, %v1452_v8  ;;  %vm28_vm0 = vcmask 254976  }
 0x151   :  { %1229 = vmatpush3.msk.msra.mxu1 %vm541_vm1, %v1452_v8  ;;  %29 = vst.msk [vmem:[#allocation2] sm:$0x3] %vm28_vm0, %v1453_v31  ;;  %vm1454_vm1 = vmmov 0  }
 0x152   :  { %1230 = vmatprep.subr.msk.mxu1 %vm556_vm2, %v1452_v8  ;;  %vm876_vm2 = vcmask 261120  }
 0x153   :  { %1231 = vmatpush3.msk.msra.mxu1 %vm540_vm3, %v1452_v8  ;;  %vm950_vm3 = vcmask 9216  }
 0x154   :  { %1232 = vmatprep.subr.msk.mxu1 %vm555_vm4, %v1452_v8 }
 0x155   :  { %1233 = vmatpush3.msk.msra.mxu1 %vm539_vm5, %v1452_v8 }
 0x156   :  { %1234 = vmatprep.subr.msk.mxu1 %vm554_vm6, %v1452_v8 }
 0x157   :  { %1235 = vmatpush3.msk.msra.mxu1 %vm538_vm7, %v1452_v8 }
 0x158   :  { %1236 = vmatprep.subr.msk.mxu1 %vm553_vm8, %v1452_v8  ;;  %v694_v41 = vld [vmem:[#allocation2] sm:$0x3] }
 0x159   :  { %1237 = vmatpush3.msk.msra.mxu1 %vm537_vm9, %v1452_v8 }
 0x15a   :  { %1238 = vmatprep.subr.msk.mxu1 %vm552_vm10, %v1452_v8 }
 0x15b   :  { %1239 = vmatpush3.msk.msra.mxu1 %vm536_vm11, %v1452_v8 }
 0x15c   :  { %1240 = vmatprep.subr.msk.mxu1 %vm551_vm12, %v1452_v8 }
 0x15d   :  { %1241 = vmatpush3.msk.msra.mxu1 %vm535_vm13, %v1452_v8 }
 0x15e   :  { %1242 = vmatprep.subr.msk.mxu1 %vm550_vm14, %v1452_v8 }
 0x15f   :  { %1243 = vmatpush3.msk.msra.mxu1 %vm534_vm15, %v1452_v8 }
 0x160   :  { %853 = vmatmul.mubr.f32.vlgmr.msra.gmra.mxu1 %v1738_v26  ;;  %1380 = vmatprep.subr.mxu1 %v1453_v31  ;;  %v866_v26 = vld [vmem:[%s2027_s4 + $0x8] sm:$0xff]  ;;  %s1455_s4 = smov [#allocation3]  }
 0x161   :  { %1381 = vmatpush3.msra.mxu1 %v868_v32  ;;  %1388 = vmatprep.mubr.msk.f32.mxu1 %vm1454_vm1, %v1453_v31  ;;  %s958_s18 = sshll.u32 %s1455_s4, 4  ;;  %s959_s18 = int_to_ptr.vmem [resolvable:$true] %s958_s18 }
 0x162   :  { %1382 = vmatprep.subr.mxu1 %v1453_v31  ;;  %s1429_s19 = scalar_lea.vmem %s959_s18, 32  ;;  %p1434_p1 = scmp.lt.s32.totalorder %s959_s18, %s959_s18 }
 0x163   :  { %1383 = vmatpush3.msra.mxu1 %v867_v33  ;;  %p1430_p0 = scmp.ne.s32.totalorder %s959_s18, %s1429_s19  ;;  %p1435_p2 = scmp.lt.s32.totalorder %s1429_s19, %s1429_s19 }
 0x164   :  { %1384 = vmatprep.subr.mxu1 %v1453_v31 }
 0x165   :  { %1385 = vmatpush3.msra.mxu1 %v866_v26  ;;  %p1436_p3 = por %p1435_p2, %p1434_p1 }
 0x166   :  { %1386 = vmatprep.subr.mxu1 %v1453_v31 }
 0x167   :  { %1387 = vmatpush3.msra.mxu1 %v865_v34  ;;  %p1437_p4 = pnand %p1436_p3, %p1430_p0 }
 0x200   :  { %v1209_v35 = vpop.f32.mrf.mxu1 }
 0x202   :  { %v1210_v36 = vpop.f32.mrf.mxu1 }
 0x203   :  { %v1211_v39 = vadd.f32 %v1210_v36, %v1209_v35 }
 0x220   :  { %v1244_v37 = vpop.f32.mrf.mxu1 }
 0x222   :  { %v1245_v38 = vpop.f32.mrf.mxu1 }
 0x223   :  { %v1246_v40 = vadd.f32 %v1245_v38, %v1244_v37 }
 0x225   :  { %v855_v42 = vadd.f32 %v1246_v40, %v1211_v39 }
 0x227   :  { %v858_v43 = vadd.f32 %v855_v42, %v694_v41 }
 0x229   :  { %860 = vst.msk [vmem:[#allocation2] sm:$0x3] %vm28_vm0, %v858_v43 }
 0x230   :  { %v864_v44 = vld [vmem:[#allocation2] sm:$0x3] }
 0x231   :  { %1389 = vmatmul.mubr.msk.f32.vlgmr.msra.gmra.mxu1 %vm876_vm2, %v864_v44 }
 0x2f1   :  { %v946_v46 = vpop.f32.mrf.mxu1 }
 0x2f2   :  { %v947_v47 = vadd.f32 %v1095_v45, %v946_v46 }
 0x2f3   :  { %v1390_v48 = vpop.f32.mrf.mxu1 }
 0x2f4   :  { %951 = vst.msk [vmem:[#allocation3] sm:$0x3] %vm950_vm3, %v947_v47 }
 0x2f5   :  { %1440 = shalt.err (!%p1437_p4)
}
 0x2f6   :  { %961 = dma.vmem_to_hbm [thread:$0]  %s959_s18, 32, %s2029_s6, [#allocation4]  }
 0x2f7   :  { %1449 = dma.done.wait [#allocation4], 32  }
 0x2f8   :  { %1450 = vsyncadd [#allocation4], 4294967264 }
 0x2f9   :  { %965 = vsyncpa [#allocation4], 1 }

</bundles_post_ra>
